<compile_context>
chip_gen: v7x
topology: tpu7x:2x2x1
jax: 0.10.0
libtpu: 0.0.40
codegen_flags: <defaults>
</compile_context>

<pallas_src>
import functools

import jax
import jax.numpy as jnp
from jax.experimental import pallas as pl
from jax.experimental.pallas import tpu as pltpu


def _round_up(a: int, b: int) -> int:
    return ((a + b - 1) // b) * b


def _drop_path_kernel(scale_ref, x_ref, o_ref):
    # scale_ref: scalar-prefetched (B,) f32 per-sample scale (0.0 or 1/keep) in SMEM
    # x_ref / o_ref: (1, block_rows, 128) lane-dense tile of the current sample
    b = pl.program_id(0)
    o_ref[...] = (x_ref[...] * scale_ref[b]).astype(o_ref.dtype)


def drop_path(x, drop_probability: float = 0.0, training: bool = False, *, key=None):
    """JAX/Pallas equivalent of the PyTorch `drop_path` function."""
    if drop_probability == 0.0 or not training:
        return x
    if key is None:
        raise ValueError(
            "drop_path: a PRNG key is required in training mode with drop_probability > 0 "
            "(otherwise the same samples would be dropped on every call)."
        )

    keep_prob = 1.0 - float(drop_probability)
    B = x.shape[0]

    # Per-sample scale, computed in float32 regardless of x.dtype (avoids the
    # coarse-uniform bias of drawing rand in bf16/fp8):
    #   floor(keep + U[0,1)) == bernoulli(keep);  scale = mask / keep
    rand = jax.random.uniform(key, (B,), dtype=jnp.float32)
    mask = jnp.floor(keep_prob + rand)                      # 0.0 or 1.0 per sample
    scale = mask * (1.0 / keep_prob)                        # 0.0 or 1/keep per sample

    # ---- lane-dense 2D-per-sample layout ------------------------------------
    orig_shape = x.shape
    F = 1
    for d in orig_shape[1:]:
        F *= int(d)
    F = max(F, 1)

    lane = 128
    itemsize = jnp.dtype(x.dtype).itemsize
    sub = max(8, 32 // itemsize)                            # 8 f32, 16 bf16, 32 int8
    rows_needed = -(-F // lane)                             # cdiv(F, 128)
    target_rows = max(sub, (1 << 20) // (lane * itemsize))  # ~1 MiB block
    block_rows = min(_round_up(rows_needed, sub), _round_up(target_rows, sub))
    total_rows = _round_up(rows_needed, block_rows)
    F_pad = total_rows * lane

    x2 = x.reshape(B, F)
    if F_pad != F:
        x2 = jnp.pad(x2, ((0, 0), (0, F_pad - F)))
    x3 = x2.reshape(B, total_rows, lane)

    grid = (B, total_rows // block_rows)

    out = pl.pallas_call(
        _drop_path_kernel,
        out_shape=jax.ShapeDtypeStruct((B, total_rows, lane), x.dtype),
        grid_spec=pltpu.PrefetchScalarGridSpec(
            num_scalar_prefetch=1,            # scale lands in SMEM before the grid
            grid=grid,
            in_specs=[
                pl.BlockSpec((1, block_rows, lane), lambda b, t, scale: (b, t, 0)),
            ],
            out_specs=pl.BlockSpec((1, block_rows, lane), lambda b, t, scale: (b, t, 0)),
        ),
        compiler_params=pltpu.CompilerParams(
            dimension_semantics=("parallel", "parallel"),
        ),
    )(scale, x3)

    out = out.reshape(B, F_pad)
    if F_pad != F:
        out = out[:, :F]
    return out.reshape(orig_shape)


class DropPath:
    """Drop paths (Stochastic Depth) per sample, Pallas-backed."""

    def __init__(self, drop_probability=None):
        self.drop_probability = drop_probability
        self.training = True

    def __call__(self, x, key=None):
        p = 0.0 if self.drop_probability is None else self.drop_probability
        return drop_path(x, p, self.training, key=key)


if __name__ == "__main__":
    key = jax.random.PRNGKey(0)
    kx, kmask = jax.random.split(key)

    B, N, D = 2, 8, 32
    x = jax.random.normal(kx, (B, N, D), dtype=jnp.float32)

    # Training path with nonzero drop probability (exercises the kernel).
    module = DropPath(drop_probability=0.25)
    module.training = True
    out = module(x, key=kmask)
    out = jax.block_until_ready(out)

    # Reference check (pure JAX) for the same mask draw.
    keep = 1.0 - 0.25
    rand = jax.random.uniform(kmask, (B,), dtype=jnp.float32)
    mask = jnp.floor(keep + rand).reshape(B, 1, 1)
    ref = x / keep * mask
    assert out.shape == x.shape, "shape mismatch"
    assert jnp.allclose(out, ref, atol=1e-6), "mismatch vs reference"

    # Eval path: identity (no kernel launch, no key needed).
    module.training = False
    out_eval = jax.block_until_ready(module(x))
    assert jnp.array_equal(out_eval, x), "eval path must be identity"

    print("KERNEL_OK")
</pallas_src>

<mosaic_0001>
module attributes {stable_mosaic.version = 11 : i64} {
  func.func @_drop_path_kernel(%arg0: i32, %arg1: i32, %arg2: memref<2xf32, #tpu.memory_space<smem>>, %arg3: memref<1x8x128xf32, #tpu.memory_space<vmem>>, %arg4: memref<1x8x128xf32, #tpu.memory_space<vmem>>) attributes {dimension_semantics = [#tpu.dimension_semantics<parallel>, #tpu.dimension_semantics<parallel>], iteration_bounds = array<i64: 2, 1>, scalar_prefetch = 1 : i64, scratch_operands = 0 : i64, tpu.core_type = #tpu.core_type<tc>, window_params = [{transform_indices = @transform_0, window_bounds = array<i64: 1, 8, 128>}, {transform_indices = @transform_1, window_bounds = array<i64: 1, 8, 128>}]} {
    %c0 = arith.constant 0 : index
    %c0_0 = arith.constant 0 : index
    %c0_1 = arith.constant 0 : index
    %0 = vector.load %arg3[%c0, %c0_0, %c0_1] : memref<1x8x128xf32, #tpu.memory_space<vmem>>, vector<1x8x128xf32>
    %1 = arith.index_cast %arg0 : i32 to index
    %2 = memref.load %arg2[%1] : memref<2xf32, #tpu.memory_space<smem>>
    %3 = vector.broadcast %2 : f32 to vector<1x8x128xf32>
    %4 = arith.mulf %0, %3 : vector<1x8x128xf32>
    %c0_2 = arith.constant 0 : index
    %c0_3 = arith.constant 0 : index
    %c0_4 = arith.constant 0 : index
    %5 = vector.load %arg4[%c0_2, %c0_3, %c0_4] : memref<1x8x128xf32, #tpu.memory_space<vmem>>, vector<1x8x128xf32>
    tpu.vector_store %arg4[%c0_2, %c0_3, %c0_4], %4 {strides = array<i32>} : memref<1x8x128xf32, #tpu.memory_space<vmem>>, vector<1x8x128xf32>,
    return
  }
  func.func @transform_0(%arg0: i32, %arg1: i32, %arg2: memref<2xf32, #tpu.memory_space<smem>>) -> (i32, i32, i32) {
    %c0_i32 = arith.constant 0 : i32
    %c0_i32_0 = arith.constant 0 : i32
    return %arg0, %arg1, %c0_i32 : i32, i32, i32
  }
  func.func @transform_1(%arg0: i32, %arg1: i32, %arg2: memref<2xf32, #tpu.memory_space<smem>>) -> (i32, i32, i32) {
    %c0_i32 = arith.constant 0 : i32
    %c0_i32_0 = arith.constant 0 : i32
    return %arg0, %arg1, %c0_i32 : i32, i32, i32
  }
}

</mosaic_0001>

<bundles_post_ra>
// kernel: tpu_custom_call.1
= control target key start
LH: loop header
LB: loop body
LE: loop exit
PB: predicated region body
PF: predicated region fallthrough
CT: control target
= control target key end

     0   :  { %s659_s0 = inlined_call_operand.hbm [shape: f32[2], index: 0, kind: input, shape index: {}]   ;;  %s660_s1 = inlined_call_operand.hbm [shape: f32[2,8,128], index: 1, kind: input, shape index: {}]   ;;  %s661_s2 = inlined_call_operand.hbm [shape: f32[2,8,128], index: 2, kind: output, shape index: {}]  }
   0x1   :  { %s330_s11 = scalar_lea.hbm %s659_s0, 16 }
   0x2   :  { %p331_p0 = scmp.ne.s32.totalorder %s659_s0, %s330_s11  ;;  %p334_p1 = scmp.lt.u32.totalorder %s330_s11, %s659_s0 }
   0x4   :  { %p336_p2 = pnand %p334_p1, %p331_p0 }
   0x6   :  { %339 = shalt.err (!%p336_p2)  }
   0x7   :  { %s456_s16 = smov [#allocation3]  }
   0x8   :  { %8 = dma.hbm_to_smem %s659_s0, 16, %s456_s16, [#allocation2] }
   0x9   :  { %422 = dma.done.wait [#allocation2], 16 }
   0xa   :  { %423 = vsyncadd [#allocation2], 4294967280 }
   0xb   :  { %10 = sfence }
   0xc   :  { %11 = vsyncpa [#allocation5], 0 }
   0xd   :  { %13 = vsyncpa [#allocation5 + $0x1], 0 }
   0xe   :  { %14 = vsyncpa [#allocation6], 0 }
   0xf   :  { %16 = vsyncpa [#allocation6 + $0x1], 0  ;;  %s486_s19 = smov 0   ;;  %s488_s20 = smov 0  }
  0x10   :  { %s490_s21 = smov 0   ;;  %s492_s22 = smov 0  }
  0x11   :  { %s494_s23 = smov 0   ;;  %s496_s24 = smov 0  }
  0x12 LB: > { %s254_s0 = sadd.s32 4294967295, %s454_s24   ;;  %s255_s25 = sadd.s32 4294967294, %s454_s24   ;;  %s454_s24 = sphi %s496_s24, %s22_s24   ;;  %s450_s23 = sphi %s494_s23, %s677_s23   ;;  %s446_s22 = sphi %s492_s22, %s676_s22   ;;  %s442_s21 = sphi %s490_s21, %s675_s21   ;;  %s438_s20 = sphi %s488_s20, %s674_s20   ;;  %s434_s19 = sphi %s486_s19, %s673_s19  }
  0x13   : > { %s34_s26 = sadd.s32 1, %s450_s23  ;;  %s43_s27 = sadd.s32 1, %s442_s21 }
  0x14   : > { %p36_p3 = scmp.ge.s32.totalorder %s34_s26, 2  ;;  %p50_p4 = scmp.ne.s32.totalorder %s442_s21, %s438_s20 }
  0x15   : > { %p51_p5 = scmp.eq.s32.totalorder %s454_s24, 0  ;;  %p56_p6 = scmp.ne.s32.totalorder %s438_s20, %s434_s19 }
  0x16   : > { %s679_s26 = smov (%p36_p3, %s34_s26), 0  ;;  %p57_p8 = scmp.eq.s32.totalorder %s254_s0, 0 }
  0x17   : > { %p527_p7 = por %p51_p5, %p50_p4  ;;  %s38_s29 = ssub.s32 %s450_s23, %s679_s26 }
  0x18   : > { %p82_p9 = scmp.eq.s32.totalorder %s254_s0, 1  ;;  %p41_p10 = scmp.eq.s32.totalorder %s38_s29, 0 }
  0x19   : > { %p533_p11 = por %p57_p8, %p56_p6  ;;  %p88_p13 = scmp.eq.s32.totalorder %s255_s25, 1 }
  0x1a   : > { %p537_p12 = por %p82_p9, %p50_p4  ;;  %p279_p2 = scmp.lt.s32.totalorder %s454_s24, 2 }
  0x1b   : > { %s542_s4 = scalar_select %p41_p10, %s442_s21, %s43_s27  }
  0x1c   : > { %s665_s3 = scalar_select %p537_p12, 1, 0 }
  0x1d   : > { %p544_p0 = por %p88_p13, %p56_p6  ;;  %s108_s6 = sand.u32 1, %s442_s21  }
  0x1e   : > { %s258_s7 = sshll.u32 %s108_s6, 3  ;;  %s259_s8 = sshll.u32 %s450_s23, 7 }
  0x1f   : > { %s666_s5 = scalar_select %p544_p0, 1, 0 }
  0x20   : > { %s555_s11 = scalar_lea.hbm %s660_s1, %s259_s8  ;;  %s112_s12 = scalar_lea.vmem [#allocation4], %s258_s7 }
  0x21   : > { %s120_s13 = sshll.u32 %s112_s12, 4  ;;  %p561_p3 = pnand %p279_p2, %p527_p7  ;;  %s557_s13 = int_to_ptr.vmem [resolvable:$true] %s120_s13 }
  0x22   : > { %s109_s15 = scalar_lea.sflag [#allocation5], %s108_s6  ;;  %s340_s16 = scalar_lea.hbm %s555_s11, 128 }
  0x23   : > { %p341_p6 = scmp.ne.s32.totalorder %s555_s11, %s340_s16  ;;  %p342_p8 = pneg %p561_p3 }
  0x24   : > { %s345_s0 = scalar_lea.hbm %s660_s1, 256  ;;  %p346_p7 = scmp.lt.u32.totalorder %s555_s11, %s660_s1 }
  0x25   : > { %p343_p9 = pnand %p342_p8, %p341_p6  ;;  %p347_p13 = scmp.lt.u32.totalorder %s345_s0, %s340_s16 }
  0x26   : > { %p349_p1 = scmp.lt.u32.totalorder %s340_s16, %s555_s11 }
  0x27   : > { %p344_p10 = pneg %p343_p9  ;;  %p348_p2 = por %p347_p13, %p346_p7 }
  0x29   : > { %p350_p4 = por %p349_p1, %p348_p2 }
  0x2b   : > { %p351_p5 = pnand %p350_p4, %p344_p10 }
  0x2d   : > { %354 = shalt.err (!%p351_p5)
}
  0x2e   : > { %s355_s28 = scalar_lea.vmem %s557_s13, 128  ;;  %s457_s29 = smov [#allocation4]  }
  0x2f   : > { %p356_p6 = scmp.ne.s32.totalorder %s557_s13, %s355_s28  ;;  %s360_s6 = sshll.u32 %s457_s29, 4  ;;  %s361_s6 = int_to_ptr.vmem [resolvable:$false] %s360_s6 }
  0x30   : > { %s362_s7 = scalar_lea.vmem %s361_s6, 256  ;;  %p363_p12 = scmp.lt.s32.totalorder %s557_s13, %s361_s6 }
  0x31   : > { %p358_p9 = pnand %p356_p6, %p342_p8  ;;  %p364_p7 = scmp.lt.s32.totalorder %s362_s7, %s355_s28 }
  0x33   : > { %p359_p0 = pneg %p358_p9  ;;  %p365_p13 = por %p364_p7, %p363_p12 }
  0x35   : > { %p366_p1 = pnand %p365_p13, %p359_p0 }
  0x37   : > { %369 = shalt.err (!%p366_p1)
}
  0x38   : > { %274 = dma.hbm_to_vmem [thread:$0]  (!%p561_p3), %s555_s11, 128, %s557_s13, %s109_s15  }
  0x39   : > { %p668_p4 = scmp.lt.s32.totalorder %s454_s24, 3  ;;  %p669_p5 = scmp.ge.s32.totalorder %s454_s24, 1 }
  0x3b   : > { %p126_p8 = pnand %p669_p5, %p668_p4 }
  0x3c   : > { %s597_s8 = sand.u32 (!%p126_p8), 1, %s438_s20  }
  0x3d   : > { %129 = sbr.rel (%p126_p8) target bundleno = 95 (0x5f), region = 24  ;;  %s261_s9 = sshll.u32 (!%p126_p8), %s597_s8, 3 }
  0x3e   : > { %s132_s10 = scalar_lea.sflag (!%p126_p8), [#allocation5], %s597_s8  ;;  %s135_s12 = scalar_lea.vmem (!%p126_p8), [#allocation4], %s261_s9 }
  0x44   : > { %425 = dma.done.wait (%p533_p11), %s132_s10, 128  }
  0x45   : > { %427 = vsyncadd (%p533_p11), %s132_s10, 4294967168  ;;  %s155_s11 = sld [smem:[#allocation3 + %s446_s22]]  ;;  %s153_s13 = scalar_lea.vmem [#allocation7], %s261_s9  ;;  %v154_v0 = vld [vmem:[%s135_s12] sm:$0xff] }
  0x46   : > { %s174_s14 = sshll.u32 %s153_s13, 4  ;;  %s264_s15 = sshll.u32 %s446_s22, 7  ;;  %s607_s14 = int_to_ptr.vmem [resolvable:$true] %s174_s14 }
  0x47   : > { %s612_s30 = scalar_lea.hbm %s661_s2, %s264_s15  ;;  %s160_s18 = scalar_lea.sflag [#allocation6], %s597_s8 }
  0x48   : > { %s370_s0 = scalar_lea.vmem %s607_s14, 128  ;;  %p670_p12 = scmp.ne.s32.totalorder %s665_s3, 0 }
  0x49   : > { %p371_p11 = scmp.ne.s32.totalorder %s607_s14, %s370_s0  ;;  %s458_s22 = smov [#allocation7]  }
  0x4a   : > { %s374_s25 = sshll.u32 %s458_s22, 4  ;;  %s375_s25 = int_to_ptr.vmem [resolvable:$false] %s374_s25 }
  0x4b   : > { %v156_v1 = vstv %s155_s11  ;;  %p372_p0 = pnand %p371_p11, %p670_p12  ;;  %s376_s27 = scalar_lea.vmem %s375_s25, 256 }
  0x4c   : > { %v157_v2 = vmul.f32 %v156_v1, %v154_v0  ;;  %p377_p10 = scmp.lt.s32.totalorder %s607_s14, %s375_s25  ;;  %p378_p2 = scmp.lt.s32.totalorder %s376_s27, %s370_s0 }
  0x4d   : > { %p373_p3 = pneg %p372_p0 }
  0x4e   : > { %158 = vst [vmem:[%s153_s13] sm:$0xff] %v157_v2  ;;  %p379_p6 = por %p378_p2, %p377_p10 }
  0x50   : > { %p380_p9 = pnand %p379_p6, %p373_p3 }
  0x52   : > { %383 = shalt.err (!%p380_p9)
}
  0x53   : > { %s384_s28 = scalar_lea.hbm %s612_s30, 128  ;;  %s388_s7 = scalar_lea.hbm %s661_s2, 256 }
  0x54   : > { %p385_p7 = scmp.ne.s32.totalorder %s612_s30, %s384_s28  ;;  %p389_p4 = scmp.lt.u32.totalorder %s612_s30, %s661_s2 }
  0x55   : > { %p390_p5 = scmp.lt.u32.totalorder %s388_s7, %s384_s28  ;;  %p392_p11 = scmp.lt.u32.totalorder %s384_s28, %s612_s30 }
  0x56   : > { %p386_p13 = pnand %p385_p7, %p670_p12 }
  0x57   : > { %p391_p8 = por %p390_p5, %p389_p4 }
  0x58   : > { %p387_p1 = pneg %p386_p13 }
  0x59   : > { %p393_p0 = por %p392_p11, %p391_p8 }
  0x5b   : > { %p394_p3 = pnand %p393_p0, %p387_p1 }
  0x5d   : > { %397 = shalt.err (!%p394_p3)
}
  0x5e   : > { %269 = dma.vmem_to_hbm [thread:$0]  (%p670_p12), %s607_s14, 128, %s612_s30, %s160_s18  }
  0x5f PF: > { %s186_s10 = sand.u32 1, %s434_s19   ;;  %p671_p10 = scmp.ne.s32.totalorder %s666_s5, 0 }
  0x60   : > { %p672_p2 = scmp.ge.s32.totalorder %s454_s24, 2  ;;  %s187_s12 = scalar_lea.sflag [#allocation6], %s186_s10 }
  0x62   : > { %p276_p6 = pnand %p672_p2, %p671_p10 }
  0x64   : > { %429 = dma.done.wait (!%p276_p6), %s187_s12, 128  }
  0x65   : > { %431 = vsyncadd (!%p276_p6), %s187_s12, 4294967168  ;;  %s22_s24 = sadd.s32 1, %s454_s24   ;;  %s673_s19 = smov %s438_s20 }
  0x66   : > { %p19_p9 = scmp.ge.s32.totalorder %s22_s24, 4   ;;  %s674_s20 = smov %s442_s21 }
  0x67   : > { %s675_s21 = smov %s542_s4  ;;  %s676_s22 = smov %s450_s23 }
  0x68   : > { %s677_s23 = smov %s679_s26  ;;  %21 = sbr.rel (!%p19_p9) target bundleno = 18 (0x12), region = 69 }
  0x6f   :  { %192 = vsyncpa [#allocation5], 1 }
  0x70   :  { %194 = vsyncpa [#allocation5 + $0x1], 1 }
  0x71   :  { %195 = vsyncpa [#allocation6], 1 }
  0x72   :  { %197 = vsyncpa [#allocation6 + $0x1], 1 }

</bundles_post_ra>
